<compile_context>
chip_gen: v5e
topology: v5e:2x2
jax: 0.10.0
libtpu: 0.0.40
codegen_flags: <defaults>
</compile_context>

<pallas_src>
import jax
import jax.numpy as jnp
from jax import lax
from jax.experimental import pallas as pl
from jax.experimental.pallas import tpu as pltpu


_NEG_BIG = -1e30  # finite "-inf": keeps softmax NaN-free on fully-masked rows


def _mem_question_attn_kernel(
    lens_ref,    # SMEM (B, TL_pad) int32  scalar-prefetch: valid words per turn
    turns_ref,   # SMEM (B,)        int32  scalar-prefetch: valid turns per batch
    src_ref,     # VMEM (1, 1, indim)
    mb_ref,      # VMEM (1, tl_blk, WL, D)
    ww_ref,      # VMEM (indim, D)  word_linear_in weight, pre-transposed
    wt_ref,      # VMEM (indim, D)  turn_linear_in weight, pre-transposed
    ct_ref,      # VMEM (1, 1, D)   output block (resident across TL tiles)
    qw_sc,       # VMEM (1, D) f32  q_word = src @ Ww^T (per batch element)
    qt_sc,       # VMEM (1, D) f32  q_turn = src @ Wt^T
    m_sc,        # VMEM (1, 1) f32  running max   (turn-level online softmax)
    l_sc,        # VMEM (1, 1) f32  running denominator
    acc_sc,      # VMEM (1, D) f32  running numerator
):
    b = pl.program_id(0)
    t = pl.program_id(1)
    tl_blk, WL = mb_ref.shape[1], mb_ref.shape[2]

    # Per-batch-element init: project the single query once, reset accumulators.
    @pl.when(t == 0)
    def _init():
        src = src_ref[0]                                          # (1, indim)
        qw_sc[...] = jnp.dot(src, ww_ref[...],
                             preferred_element_type=jnp.float32)  # (1, D)
        qt_sc[...] = jnp.dot(src, wt_ref[...],
                             preferred_element_type=jnp.float32)  # (1, D)
        m_sc[...] = jnp.full(m_sc.shape, -jnp.inf, jnp.float32)
        l_sc[...] = jnp.zeros(l_sc.shape, jnp.float32)
        acc_sc[...] = jnp.zeros(acc_sc.shape, jnp.float32)

    q_word = qw_sc[...]                                           # (1, D)
    q_turn = qt_sc[...]                                           # (1, D)
    n_turns = turns_ref[b]                                        # scalar

    m_i = m_sc[...]
    l_i = l_sc[...]
    acc = acc_sc[...]
    w_iota = lax.broadcasted_iota(jnp.int32, (1, WL), 1)

    for j in range(tl_blk):  # static unroll over the turns of this tile
        mb_j = mb_ref[0, j]                                       # (WL, D)
        n_words = lens_ref[b, t * tl_blk + j]                     # scalar

        # ---- word-level attention inside this turn ----
        # scores[w] = q_word . mb_j[w, :]   (contract last dims, no transpose)
        s = lax.dot_general(q_word, mb_j,
                            dimension_numbers=(((1,), (1,)), ((), ())),
                            preferred_element_type=jnp.float32)   # (1, WL)
        s = jnp.where(w_iota < n_words, s, _NEG_BIG)
        s_max = jnp.max(s, axis=1, keepdims=True)
        p = jnp.exp(s - s_max)
        p = p / jnp.sum(p, axis=1, keepdims=True)
        p = jnp.where(n_words > 0, p, jnp.zeros_like(p))          # pad turns -> 0

        # word context for this turn: (1, WL) @ (WL, D) -> (1, D)
        cw = jnp.dot(p, mb_j, preferred_element_type=jnp.float32)

        # ---- turn-level attention, streamed across TL tiles ----
        ts = jnp.sum(q_turn * cw, axis=1, keepdims=True)          # (1, 1)
        ts = jnp.where(t * tl_blk + j < n_turns, ts,
                       jnp.full_like(ts, _NEG_BIG))

        m_new = jnp.maximum(m_i, ts)
        alpha = jnp.exp(m_i - m_new)
        w = jnp.exp(ts - m_new)
        l_i = alpha * l_i + w
        acc = alpha * acc + w * cw
        m_i = m_new

    m_sc[...] = m_i
    l_sc[...] = l_i
    acc_sc[...] = acc

    @pl.when(t == pl.num_programs(1) - 1)
    def _finalize():
        ct_ref[0] = (acc_sc[...] / l_sc[...]).astype(ct_ref.dtype)


def mem_question_attention_forward(source, memory_bank, memory_lengths,
                                   memory_turns, w_word, w_turn, *,
                                   tl_block=None):
    """Pallas forward pass of MemQuestionAttention (softmax attn_func).

    source         : [B, indim] or [B, 1, indim]
    memory_bank    : [B, TL, WL, outdim]
    memory_lengths : [B, TL] int (valid words per turn; 0 = padded turn)
    memory_turns   : [B]     int (valid turns per batch element)
    w_word, w_turn : [outdim, indim]  (nn.Linear(indim, outdim, bias=False).weight)
    returns        : [B, outdim]   (== ct.squeeze(1) of the PyTorch module)
    """
    if source.ndim == 2:
        source = source[:, None, :]
    B, target_l, indim = source.shape
    assert target_l == 1, "reference forward requires target_l == 1"
    Bm, TL, WL, D = memory_bank.shape
    assert Bm == B
    assert w_word.shape == (D, indim) and w_turn.shape == (D, indim)
    assert memory_lengths.shape == (B, TL) and memory_turns.shape == (B,)

    if tl_block is None:
        tl_block = TL if TL <= 8 else 8
    n_tiles = pl.cdiv(TL, tl_block)
    TL_pad = n_tiles * tl_block
    if TL_pad != TL:  # pad turns: zero bank + zero length => masked everywhere
        memory_bank = jnp.pad(
            memory_bank, ((0, 0), (0, TL_pad - TL), (0, 0), (0, 0)))
        memory_lengths = jnp.pad(memory_lengths, ((0, 0), (0, TL_pad - TL)))

    src = source.astype(jnp.float32)
    mb = memory_bank.astype(jnp.float32)
    lens = memory_lengths.astype(jnp.int32)
    turns = memory_turns.astype(jnp.int32)
    # Pre-transpose the Linear weights once -> all in-kernel dots are
    # transpose-free (contraction on the last dim of both operands).
    ww_t = w_word.astype(jnp.float32).T                           # (indim, D)
    wt_t = w_turn.astype(jnp.float32).T                           # (indim, D)

    grid = (B, n_tiles)
    grid_spec = pltpu.PrefetchScalarGridSpec(
        num_scalar_prefetch=2,
        grid=grid,
        in_specs=[
            pl.BlockSpec((1, 1, indim), lambda b, t, l, n: (b, 0, 0)),
            pl.BlockSpec((1, tl_block, WL, D), lambda b, t, l, n: (b, t, 0, 0)),
            pl.BlockSpec((indim, D), lambda b, t, l, n: (0, 0)),
            pl.BlockSpec((indim, D), lambda b, t, l, n: (0, 0)),
        ],
        out_specs=pl.BlockSpec((1, 1, D), lambda b, t, l, n: (b, 0, 0)),
        scratch_shapes=[
            pltpu.VMEM((1, D), jnp.float32),   # q_word
            pltpu.VMEM((1, D), jnp.float32),   # q_turn
            pltpu.VMEM((1, 1), jnp.float32),   # m
            pltpu.VMEM((1, 1), jnp.float32),   # l
            pltpu.VMEM((1, D), jnp.float32),   # acc
        ],
    )

    # Size the scoped-VMEM limit from the actual tile footprint (double-buffered
    # inputs + weights + output block + scratch), with headroom; cap under the
    # v7x 64 MiB physical budget.
    block_bytes = 4 * (2 * tl_block * WL * D + 2 * indim + 4 * indim * D
                       + 2 * D + 3 * D + 2)
    vmem_limit = int(min(64 * 2**20, max(32 * 2**20, 4 * block_bytes)))

    ct = pl.pallas_call(
        _mem_question_attn_kernel,
        out_shape=jax.ShapeDtypeStruct((B, 1, D), jnp.float32),
        grid_spec=grid_spec,
        compiler_params=pltpu.CompilerParams(
            dimension_semantics=("parallel", "arbitrary"),
            vmem_limit_bytes=vmem_limit,
        ),
    )(lens, turns, src, mb, ww_t, wt_t)
    return ct[:, 0, :]


if __name__ == "__main__":
    key = jax.random.PRNGKey(0)
    B, TL, WL = 2, 6, 16
    indim, outdim = 32, 32

    k_src, k_mb, k_ww, k_wt = jax.random.split(key, 4)
    source = jax.random.normal(k_src, (B, 1, indim), dtype=jnp.float32)
    memory_bank = jax.random.normal(k_mb, (B, TL, WL, outdim), dtype=jnp.float32)
    bound = 1.0 / (indim ** 0.5)
    w_word = jax.random.uniform(k_ww, (outdim, indim), jnp.float32, -bound, bound)
    w_turn = jax.random.uniform(k_wt, (outdim, indim), jnp.float32, -bound, bound)

    memory_lengths = jnp.array([[16, 9, 5, 12, 0, 0],
                                [7, 16, 3, 11, 8, 2]], dtype=jnp.int32)
    memory_turns = jnp.array([4, 6], dtype=jnp.int32)

    ct = mem_question_attention_forward(
        source, memory_bank, memory_lengths, memory_turns, w_word, w_turn,
        tl_block=4)  # TL=6 -> padded to 8, two TL tiles (exercises streaming path)
    ct = jax.block_until_ready(ct)

    # ---- pure-JAX reference of the forward pass ----
    def reference(source, memory_bank, memory_lengths, memory_turns,
                  w_word, w_turn):
        Bb, TLl, WLl, Dd = memory_bank.shape
        src = source.reshape(Bb, -1)                        # target_l == 1
        q_w = src @ w_word.T                                # (B, D)
        q_t = src @ w_turn.T                                # (B, D)
        word_align = jnp.einsum("bd,btwd->btw", q_w, memory_bank)
        w_idx = jnp.arange(WLl)[None, None, :]
        lens = memory_lengths[:, :, None]
        word_align = jnp.where(w_idx < lens, word_align, _NEG_BIG)
        word_p = jax.nn.softmax(word_align, axis=-1)
        word_p = word_p * (lens > 0)                        # zero padded turns
        cw = jnp.einsum("btw,btwd->btd", word_p, memory_bank)
        turn_align = jnp.einsum("bd,btd->bt", q_t, cw)
        t_idx = jnp.arange(TLl)[None, :]
        turn_align = jnp.where(t_idx < memory_turns[:, None], turn_align,
                               _NEG_BIG)
        turn_p = jax.nn.softmax(turn_align, axis=-1)
        return jnp.einsum("bt,btd->bd", turn_p, cw)

    ref = reference(source, memory_bank, memory_lengths, memory_turns,
                    w_word, w_turn)
    assert ct.shape == (B, outdim)
    err = float(jnp.max(jnp.abs(ct - ref)))
    assert jnp.allclose(ct, ref, atol=1e-4, rtol=1e-4), err

    print("KERNEL_OK")
</pallas_src>

<mosaic_0001>
module attributes {stable_mosaic.version = 11 : i64} {
  func.func @_mem_question_attn_kernel(%arg0: i32, %arg1: i32, %arg2: memref<2x8xi32, #tpu.memory_space<smem>>, %arg3: memref<2xi32, #tpu.memory_space<smem>>, %arg4: memref<1x1x32xf32, #tpu.memory_space<vmem>>, %arg5: memref<1x4x16x32xf32, #tpu.memory_space<vmem>>, %arg6: memref<32x32xf32, #tpu.memory_space<vmem>>, %arg7: memref<32x32xf32, #tpu.memory_space<vmem>>, %arg8: memref<1x1x32xf32, #tpu.memory_space<vmem>>, %arg9: memref<1x32xf32, #tpu.memory_space<vmem>>, %arg10: memref<1x32xf32, #tpu.memory_space<vmem>>, %arg11: memref<1x1xf32, #tpu.memory_space<vmem>>, %arg12: memref<1x1xf32, #tpu.memory_space<vmem>>, %arg13: memref<1x32xf32, #tpu.memory_space<vmem>>) attributes {dimension_semantics = [#tpu.dimension_semantics<parallel>, #tpu.dimension_semantics<arbitrary>], iteration_bounds = array<i64: 2, 2>, scalar_prefetch = 2 : i64, scratch_operands = 5 : i64, tpu.core_type = #tpu.core_type<tc>, window_params = [{transform_indices = @transform_0, window_bounds = array<i64: 1, 1, 32>}, {transform_indices = @transform_1, window_bounds = array<i64: 1, 4, 16, 32>}, {pipeline_mode = #tpu.pipeline_mode<synchronous>, transform_indices = @transform_2, window_bounds = array<i64: 32, 32>}, {pipeline_mode = #tpu.pipeline_mode<synchronous>, transform_indices = @transform_3, window_bounds = array<i64: 32, 32>}, {transform_indices = @transform_4, window_bounds = array<i64: 1, 1, 32>}]} {
    %c0_i32 = arith.constant 0 : i32
    %0 = arith.cmpi eq, %arg1, %c0_i32 : i32
    %1 = arith.extui %0 : i1 to i32
    %c0_i32_0 = arith.constant 0 : i32
    %2 = arith.cmpi ne, %1, %c0_i32_0 : i32
    scf.if %2 {
      %c0_78 = arith.constant 0 : index
      %c0_79 = arith.constant 0 : index
      %c0_80 = arith.constant 0 : index
      %197 = vector.load %arg4[%c0_78, %c0_79, %c0_80] : memref<1x1x32xf32, #tpu.memory_space<vmem>>, vector<1x1x32xf32>
      %198 = vector.shape_cast %197 : vector<1x1x32xf32> to vector<1x32xf32>
      %c0_81 = arith.constant 0 : index
      %c0_82 = arith.constant 0 : index
      %199 = vector.load %arg6[%c0_81, %c0_82] : memref<32x32xf32, #tpu.memory_space<vmem>>, vector<32x32xf32>
      %cst_83 = arith.constant dense<0.000000e+00> : vector<1x32xf32>
      %200 = tpu.matmul %198, %199, %cst_83 {dimension_numbers = #tpu.dot_dimension_numbers<[1], [0], [0], [1], [0, 0, 1, 1], [], []>} : vector<1x32xf32>, vector<32x32xf32>, vector<1x32xf32> -> vector<1x32xf32>
      %c0_84 = arith.constant 0 : index
      %c0_85 = arith.constant 0 : index
      %201 = vector.load %arg9[%c0_84, %c0_85] : memref<1x32xf32, #tpu.memory_space<vmem>>, vector<1x32xf32>
      tpu.vector_store %arg9[%c0_84, %c0_85], %200 {strides = array<i32>} : memref<1x32xf32, #tpu.memory_space<vmem>>, vector<1x32xf32>,
      %c0_86 = arith.constant 0 : index
      %c0_87 = arith.constant 0 : index
      %202 = vector.load %arg7[%c0_86, %c0_87] : memref<32x32xf32, #tpu.memory_space<vmem>>, vector<32x32xf32>
      %cst_88 = arith.constant dense<0.000000e+00> : vector<1x32xf32>
      %203 = tpu.matmul %198, %202, %cst_88 {dimension_numbers = #tpu.dot_dimension_numbers<[1], [0], [0], [1], [0, 0, 1, 1], [], []>} : vector<1x32xf32>, vector<32x32xf32>, vector<1x32xf32> -> vector<1x32xf32>
      %c0_89 = arith.constant 0 : index
      %c0_90 = arith.constant 0 : index
      %204 = vector.load %arg10[%c0_89, %c0_90] : memref<1x32xf32, #tpu.memory_space<vmem>>, vector<1x32xf32>
      tpu.vector_store %arg10[%c0_89, %c0_90], %203 {strides = array<i32>} : memref<1x32xf32, #tpu.memory_space<vmem>>, vector<1x32xf32>,
      %cst_91 = arith.constant 0xFF800000 : f32
      %205 = vector.broadcast %cst_91 : f32 to vector<1x1xf32>
      %c0_92 = arith.constant 0 : index
      %c0_93 = arith.constant 0 : index
      %206 = vector.load %arg11[%c0_92, %c0_93] : memref<1x1xf32, #tpu.memory_space<vmem>>, vector<1x1xf32>
      tpu.vector_store %arg11[%c0_92, %c0_93], %205 {strides = array<i32>} : memref<1x1xf32, #tpu.memory_space<vmem>>, vector<1x1xf32>,
      %cst_94 = arith.constant 0.000000e+00 : f32
      %207 = vector.broadcast %cst_94 : f32 to vector<1x1xf32>
      %c0_95 = arith.constant 0 : index
      %c0_96 = arith.constant 0 : index
      %208 = vector.load %arg12[%c0_95, %c0_96] : memref<1x1xf32, #tpu.memory_space<vmem>>, vector<1x1xf32>
      tpu.vector_store %arg12[%c0_95, %c0_96], %207 {strides = array<i32>} : memref<1x1xf32, #tpu.memory_space<vmem>>, vector<1x1xf32>,
      %cst_97 = arith.constant 0.000000e+00 : f32
      %209 = vector.broadcast %cst_97 : f32 to vector<1x32xf32>
      %c0_98 = arith.constant 0 : index
      %c0_99 = arith.constant 0 : index
      %210 = vector.load %arg13[%c0_98, %c0_99] : memref<1x32xf32, #tpu.memory_space<vmem>>, vector<1x32xf32>
      tpu.vector_store %arg13[%c0_98, %c0_99], %209 {strides = array<i32>} : memref<1x32xf32, #tpu.memory_space<vmem>>, vector<1x32xf32>,
    } else {
    }
    %c0 = arith.constant 0 : index
    %c0_1 = arith.constant 0 : index
    %3 = vector.load %arg9[%c0, %c0_1] : memref<1x32xf32, #tpu.memory_space<vmem>>, vector<1x32xf32>
    %c0_2 = arith.constant 0 : index
    %c0_3 = arith.constant 0 : index
    %4 = vector.load %arg10[%c0_2, %c0_3] : memref<1x32xf32, #tpu.memory_space<vmem>>, vector<1x32xf32>
    %5 = arith.index_cast %arg0 : i32 to index
    %6 = memref.load %arg3[%5] : memref<2xi32, #tpu.memory_space<smem>>
    %c0_4 = arith.constant 0 : index
    %c0_5 = arith.constant 0 : index
    %7 = vector.load %arg11[%c0_4, %c0_5] : memref<1x1xf32, #tpu.memory_space<vmem>>, vector<1x1xf32>
    %c0_6 = arith.constant 0 : index
    %c0_7 = arith.constant 0 : index
    %8 = vector.load %arg12[%c0_6, %c0_7] : memref<1x1xf32, #tpu.memory_space<vmem>>, vector<1x1xf32>
    %c0_8 = arith.constant 0 : index
    %c0_9 = arith.constant 0 : index
    %9 = vector.load %arg13[%c0_8, %c0_9] : memref<1x32xf32, #tpu.memory_space<vmem>>, vector<1x32xf32>
    %10 = tpu.iota {dimensions = array<i32: 1>} : vector<1x16xi32>
    %c0_10 = arith.constant 0 : index
    %c0_11 = arith.constant 0 : index
    %c0_12 = arith.constant 0 : index
    %c0_13 = arith.constant 0 : index
    %11 = vector.load %arg5[%c0_10, %c0_11, %c0_12, %c0_13] : memref<1x4x16x32xf32, #tpu.memory_space<vmem>>, vector<1x1x16x32xf32>
    %12 = vector.shape_cast %11 : vector<1x1x16x32xf32> to vector<16x32xf32>
    %c4_i32 = arith.constant 4 : i32
    %13 = arith.muli %arg1, %c4_i32 : i32
    %c0_i32_14 = arith.constant 0 : i32
    %14 = arith.addi %13, %c0_i32_14 : i32
    %15 = arith.index_cast %arg0 : i32 to index
    %16 = arith.index_cast %14 : i32 to index
    %17 = memref.load %arg2[%15, %16] : memref<2x8xi32, #tpu.memory_space<smem>>
    %cst = arith.constant dense<0.000000e+00> : vector<1x16xf32>
    %18 = tpu.matmul %3, %12, %cst {dimension_numbers = #tpu.dot_dimension_numbers<[1], [1], [0], [0], [0, 0, 1, 0], [], []>} : vector<1x32xf32>, vector<16x32xf32>, vector<1x16xf32> -> vector<1x16xf32>
    %19 = vector.broadcast %17 : i32 to vector<1x16xi32>
    %20 = arith.cmpi slt, %10, %19 : vector<1x16xi32>
    %cst_15 = arith.constant -1.000000e+30 : f32
    %21 = vector.broadcast %cst_15 : f32 to vector<1x16xf32>
    %22 = arith.select %20, %18, %21 : vector<1x16xi1>, vector<1x16xf32>
    %cst_16 = arith.constant dense<0xFF800000> : vector<1xf32>
    %23 = vector.multi_reduction <maximumf>, %22, %cst_16 [1] : vector<1x16xf32> to vector<1xf32>
    %24 = vector.shape_cast %23 : vector<1xf32> to vector<1x1xf32>
    %25 = vector.broadcast %24 : vector<1x1xf32> to vector<1x16xf32>
    %26 = arith.subf %22, %25 : vector<1x16xf32>
    %27 = math.exp %26 : vector<1x16xf32>
    %cst_17 = arith.constant dense<0.000000e+00> : vector<1xf32>
    %28 = vector.multi_reduction <add>, %27, %cst_17 [1] : vector<1x16xf32> to vector<1xf32>
    %29 = vector.shape_cast %28 : vector<1xf32> to vector<1x1xf32>
    %30 = vector.broadcast %29 : vector<1x1xf32> to vector<1x16xf32>
    %31 = arith.divf %27, %30 : vector<1x16xf32>
    %c0_i32_18 = arith.constant 0 : i32
    %32 = arith.cmpi sgt, %17, %c0_i32_18 : i32
    %cst_19 = arith.constant 0.000000e+00 : f32
    %33 = vector.broadcast %cst_19 : f32 to vector<1x16xf32>
    %34 = arith.select %32, %31, %33 : vector<1x16xf32>
    %cst_20 = arith.constant dense<0.000000e+00> : vector<1x32xf32>
    %35 = tpu.matmul %34, %12, %cst_20 {dimension_numbers = #tpu.dot_dimension_numbers<[1], [0], [0], [1], [0, 0, 1, 1], [], []>} : vector<1x16xf32>, vector<16x32xf32>, vector<1x32xf32> -> vector<1x32xf32>
    %36 = arith.mulf %4, %35 : vector<1x32xf32>
    %cst_21 = arith.constant dense<0.000000e+00> : vector<1xf32>
    %37 = vector.multi_reduction <add>, %36, %cst_21 [1] : vector<1x32xf32> to vector<1xf32>
    %38 = vector.shape_cast %37 : vector<1xf32> to vector<1x1xf32>
    %c4_i32_22 = arith.constant 4 : i32
    %39 = arith.muli %arg1, %c4_i32_22 : i32
    %c0_i32_23 = arith.constant 0 : i32
    %40 = arith.addi %39, %c0_i32_23 : i32
    %41 = arith.cmpi slt, %40, %6 : i32
    %cst_24 = arith.constant -1.000000e+30 : f32
    %42 = vector.broadcast %cst_24 : f32 to vector<1x1xf32>
    %43 = arith.select %41, %38, %42 : vector<1x1xf32>
    %44 = arith.maximumf %7, %43 : vector<1x1xf32>
    %45 = arith.subf %7, %44 : vector<1x1xf32>
    %46 = math.exp %45 : vector<1x1xf32>
    %47 = arith.subf %43, %44 : vector<1x1xf32>
    %48 = math.exp %47 : vector<1x1xf32>
    %49 = arith.mulf %46, %8 : vector<1x1xf32>
    %50 = arith.addf %49, %48 : vector<1x1xf32>
    %51 = vector.broadcast %46 : vector<1x1xf32> to vector<1x32xf32>
    %52 = arith.mulf %51, %9 : vector<1x32xf32>
    %53 = vector.broadcast %48 : vector<1x1xf32> to vector<1x32xf32>
    %54 = arith.mulf %53, %35 : vector<1x32xf32>
    %55 = arith.addf %52, %54 : vector<1x32xf32>
    %c0_25 = arith.constant 0 : index
    %c1 = arith.constant 1 : index
    %c0_26 = arith.constant 0 : index
    %c0_27 = arith.constant 0 : index
    %56 = vector.load %arg5[%c0_25, %c1, %c0_26, %c0_27] : memref<1x4x16x32xf32, #tpu.memory_space<vmem>>, vector<1x1x16x32xf32>
    %57 = vector.shape_cast %56 : vector<1x1x16x32xf32> to vector<16x32xf32>
    %c4_i32_28 = arith.constant 4 : i32
    %58 = arith.muli %arg1, %c4_i32_28 : i32
    %c1_i32 = arith.constant 1 : i32
    %59 = arith.addi %58, %c1_i32 : i32
    %60 = arith.index_cast %arg0 : i32 to index
    %61 = arith.index_cast %59 : i32 to index
    %62 = memref.load %arg2[%60, %61] : memref<2x8xi32, #tpu.memory_space<smem>>
    %cst_29 = arith.constant dense<0.000000e+00> : vector<1x16xf32>
    %63 = tpu.matmul %3, %57, %cst_29 {dimension_numbers = #tpu.dot_dimension_numbers<[1], [1], [0], [0], [0, 0, 1, 0], [], []>} : vector<1x32xf32>, vector<16x32xf32>, vector<1x16xf32> -> vector<1x16xf32>
    %64 = vector.broadcast %62 : i32 to vector<1x16xi32>
    %65 = arith.cmpi slt, %10, %64 : vector<1x16xi32>
    %cst_30 = arith.constant -1.000000e+30 : f32
    %66 = vector.broadcast %cst_30 : f32 to vector<1x16xf32>
    %67 = arith.select %65, %63, %66 : vector<1x16xi1>, vector<1x16xf32>
    %cst_31 = arith.constant dense<0xFF800000> : vector<1xf32>
    %68 = vector.multi_reduction <maximumf>, %67, %cst_31 [1] : vector<1x16xf32> to vector<1xf32>
    %69 = vector.shape_cast %68 : vector<1xf32> to vector<1x1xf32>
    %70 = vector.broadcast %69 : vector<1x1xf32> to vector<1x16xf32>
    %71 = arith.subf %67, %70 : vector<1x16xf32>
    %72 = math.exp %71 : vector<1x16xf32>
    %cst_32 = arith.constant dense<0.000000e+00> : vector<1xf32>
    %73 = vector.multi_reduction <add>, %72, %cst_32 [1] : vector<1x16xf32> to vector<1xf32>
    %74 = vector.shape_cast %73 : vector<1xf32> to vector<1x1xf32>
    %75 = vector.broadcast %74 : vector<1x1xf32> to vector<1x16xf32>
    %76 = arith.divf %72, %75 : vector<1x16xf32>
    %c0_i32_33 = arith.constant 0 : i32
    %77 = arith.cmpi sgt, %62, %c0_i32_33 : i32
    %cst_34 = arith.constant 0.000000e+00 : f32
    %78 = vector.broadcast %cst_34 : f32 to vector<1x16xf32>
    %79 = arith.select %77, %76, %78 : vector<1x16xf32>
    %cst_35 = arith.constant dense<0.000000e+00> : vector<1x32xf32>
    %80 = tpu.matmul %79, %57, %cst_35 {dimension_numbers = #tpu.dot_dimension_numbers<[1], [0], [0], [1], [0, 0, 1, 1], [], []>} : vector<1x16xf32>, vector<16x32xf32>, vector<1x32xf32> -> vector<1x32xf32>
    %81 = arith.mulf %4, %80 : vector<1x32xf32>
    %cst_36 = arith.constant dense<0.000000e+00> : vector<1xf32>
    %82 = vector.multi_reduction <add>, %81, %cst_36 [1] : vector<1x32xf32> to vector<1xf32>
    %83 = vector.shape_cast %82 : vector<1xf32> to vector<1x1xf32>
    %c4_i32_37 = arith.constant 4 : i32
    %84 = arith.muli %arg1, %c4_i32_37 : i32
    %c1_i32_38 = arith.constant 1 : i32
    %85 = arith.addi %84, %c1_i32_38 : i32
    %86 = arith.cmpi slt, %85, %6 : i32
    %cst_39 = arith.constant -1.000000e+30 : f32
    %87 = vector.broadcast %cst_39 : f32 to vector<1x1xf32>
    %88 = arith.select %86, %83, %87 : vector<1x1xf32>
    %89 = arith.maximumf %44, %88 : vector<1x1xf32>
    %90 = arith.subf %44, %89 : vector<1x1xf32>
    %91 = math.exp %90 : vector<1x1xf32>
    %92 = arith.subf %88, %89 : vector<1x1xf32>
    %93 = math.exp %92 : vector<1x1xf32>
    %94 = arith.mulf %91, %50 : vector<1x1xf32>
    %95 = arith.addf %94, %93 : vector<1x1xf32>
    %96 = vector.broadcast %91 : vector<1x1xf32> to vector<1x32xf32>
    %97 = arith.mulf %96, %55 : vector<1x32xf32>
    %98 = vector.broadcast %93 : vector<1x1xf32> to vector<1x32xf32>
    %99 = arith.mulf %98, %80 : vector<1x32xf32>
    %100 = arith.addf %97, %99 : vector<1x32xf32>
    %c0_40 = arith.constant 0 : index
    %c2 = arith.constant 2 : index
    %c0_41 = arith.constant 0 : index
    %c0_42 = arith.constant 0 : index
    %101 = vector.load %arg5[%c0_40, %c2, %c0_41, %c0_42] : memref<1x4x16x32xf32, #tpu.memory_space<vmem>>, vector<1x1x16x32xf32>
    %102 = vector.shape_cast %101 : vector<1x1x16x32xf32> to vector<16x32xf32>
    %c4_i32_43 = arith.constant 4 : i32
    %103 = arith.muli %arg1, %c4_i32_43 : i32
    %c2_i32 = arith.constant 2 : i32
    %104 = arith.addi %103, %c2_i32 : i32
    %105 = arith.index_cast %arg0 : i32 to index
    %106 = arith.index_cast %104 : i32 to index
    %107 = memref.load %arg2[%105, %106] : memref<2x8xi32, #tpu.memory_space<smem>>
    %cst_44 = arith.constant dense<0.000000e+00> : vector<1x16xf32>
    %108 = tpu.matmul %3, %102, %cst_44 {dimension_numbers = #tpu.dot_dimension_numbers<[1], [1], [0], [0], [0, 0, 1, 0], [], []>} : vector<1x32xf32>, vector<16x32xf32>, vector<1x16xf32> -> vector<1x16xf32>
    %109 = vector.broadcast %107 : i32 to vector<1x16xi32>
    %110 = arith.cmpi slt, %10, %109 : vector<1x16xi32>
    %cst_45 = arith.constant -1.000000e+30 : f32
    %111 = vector.broadcast %cst_45 : f32 to vector<1x16xf32>
    %112 = arith.select %110, %108, %111 : vector<1x16xi1>, vector<1x16xf32>
    %cst_46 = arith.constant dense<0xFF800000> : vector<1xf32>
    %113 = vector.multi_reduction <maximumf>, %112, %cst_46 [1] : vector<1x16xf32> to vector<1xf32>
    %114 = vector.shape_cast %113 : vector<1xf32> to vector<1x1xf32>
    %115 = vector.broadcast %114 : vector<1x1xf32> to vector<1x16xf32>
    %116 = arith.subf %112, %115 : vector<1x16xf32>
    %117 = math.exp %116 : vector<1x16xf32>
    %cst_47 = arith.constant dense<0.000000e+00> : vector<1xf32>
    %118 = vector.multi_reduction <add>, %117, %cst_47 [1] : vector<1x16xf32> to vector<1xf32>
    %119 = vector.shape_cast %118 : vector<1xf32> to vector<1x1xf32>
    %120 = vector.broadcast %119 : vector<1x1xf32> to vector<1x16xf32>
    %121 = arith.divf %117, %120 : vector<1x16xf32>
    %c0_i32_48 = arith.constant 0 : i32
    %122 = arith.cmpi sgt, %107, %c0_i32_48 : i32
    %cst_49 = arith.constant 0.000000e+00 : f32
    %123 = vector.broadcast %cst_49 : f32 to vector<1x16xf32>
    %124 = arith.select %122, %121, %123 : vector<1x16xf32>
    %cst_50 = arith.constant dense<0.000000e+00> : vector<1x32xf32>
    %125 = tpu.matmul %124, %102, %cst_50 {dimension_numbers = #tpu.dot_dimension_numbers<[1], [0], [0], [1], [0, 0, 1, 1], [], []>} : vector<1x16xf32>, vector<16x32xf32>, vector<1x32xf32> -> vector<1x32xf32>
    %126 = arith.mulf %4, %125 : vector<1x32xf32>
    %cst_51 = arith.constant dense<0.000000e+00> : vector<1xf32>
    %127 = vector.multi_reduction <add>, %126, %cst_51 [1] : vector<1x32xf32> to vector<1xf32>
    %128 = vector.shape_cast %127 : vector<1xf32> to vector<1x1xf32>
    %c4_i32_52 = arith.constant 4 : i32
    %129 = arith.muli %arg1, %c4_i32_52 : i32
    %c2_i32_53 = arith.constant 2 : i32
    %130 = arith.addi %129, %c2_i32_53 : i32
    %131 = arith.cmpi slt, %130, %6 : i32
    %cst_54 = arith.constant -1.000000e+30 : f32
    %132 = vector.broadcast %cst_54 : f32 to vector<1x1xf32>
    %133 = arith.select %131, %128, %132 : vector<1x1xf32>
    %134 = arith.maximumf %89, %133 : vector<1x1xf32>
    %135 = arith.subf %89, %134 : vector<1x1xf32>
    %136 = math.exp %135 : vector<1x1xf32>
    %137 = arith.subf %133, %134 : vector<1x1xf32>
    %138 = math.exp %137 : vector<1x1xf32>
    %139 = arith.mulf %136, %95 : vector<1x1xf32>
    %140 = arith.addf %139, %138 : vector<1x1xf32>
    %141 = vector.broadcast %136 : vector<1x1xf32> to vector<1x32xf32>
    %142 = arith.mulf %141, %100 : vector<1x32xf32>
    %143 = vector.broadcast %138 : vector<1x1xf32> to vector<1x32xf32>
    %144 = arith.mulf %143, %125 : vector<1x32xf32>
    %145 = arith.addf %142, %144 : vector<1x32xf32>
    %c0_55 = arith.constant 0 : index
    %c3 = arith.constant 3 : index
    %c0_56 = arith.constant 0 : index
    %c0_57 = arith.constant 0 : index
    %146 = vector.load %arg5[%c0_55, %c3, %c0_56, %c0_57] : memref<1x4x16x32xf32, #tpu.memory_space<vmem>>, vector<1x1x16x32xf32>
    %147 = vector.shape_cast %146 : vector<1x1x16x32xf32> to vector<16x32xf32>
    %c4_i32_58 = arith.constant 4 : i32
    %148 = arith.muli %arg1, %c4_i32_58 : i32
    %c3_i32 = arith.constant 3 : i32
    %149 = arith.addi %148, %c3_i32 : i32
    %150 = arith.index_cast %arg0 : i32 to index
    %151 = arith.index_cast %149 : i32 to index
    %152 = memref.load %arg2[%150, %151] : memref<2x8xi32, #tpu.memory_space<smem>>
    %cst_59 = arith.constant dense<0.000000e+00> : vector<1x16xf32>
    %153 = tpu.matmul %3, %147, %cst_59 {dimension_numbers = #tpu.dot_dimension_numbers<[1], [1], [0], [0], [0, 0, 1, 0], [], []>} : vector<1x32xf32>, vector<16x32xf32>, vector<1x16xf32> -> vector<1x16xf32>
    %154 = vector.broadcast %152 : i32 to vector<1x16xi32>
    %155 = arith.cmpi slt, %10, %154 : vector<1x16xi32>
    %cst_60 = arith.constant -1.000000e+30 : f32
    %156 = vector.broadcast %cst_60 : f32 to vector<1x16xf32>
    %157 = arith.select %155, %153, %156 : vector<1x16xi1>, vector<1x16xf32>
    %cst_61 = arith.constant dense<0xFF800000> : vector<1xf32>
    %158 = vector.multi_reduction <maximumf>, %157, %cst_61 [1] : vector<1x16xf32> to vector<1xf32>
    %159 = vector.shape_cast %158 : vector<1xf32> to vector<1x1xf32>
    %160 = vector.broadcast %159 : vector<1x1xf32> to vector<1x16xf32>
    %161 = arith.subf %157, %160 : vector<1x16xf32>
    %162 = math.exp %161 : vector<1x16xf32>
    %cst_62 = arith.constant dense<0.000000e+00> : vector<1xf32>
    %163 = vector.multi_reduction <add>, %162, %cst_62 [1] : vector<1x16xf32> to vector<1xf32>
    %164 = vector.shape_cast %163 : vector<1xf32> to vector<1x1xf32>
    %165 = vector.broadcast %164 : vector<1x1xf32> to vector<1x16xf32>
    %166 = arith.divf %162, %165 : vector<1x16xf32>
    %c0_i32_63 = arith.constant 0 : i32
    %167 = arith.cmpi sgt, %152, %c0_i32_63 : i32
    %cst_64 = arith.constant 0.000000e+00 : f32
    %168 = vector.broadcast %cst_64 : f32 to vector<1x16xf32>
    %169 = arith.select %167, %166, %168 : vector<1x16xf32>
    %cst_65 = arith.constant dense<0.000000e+00> : vector<1x32xf32>
    %170 = tpu.matmul %169, %147, %cst_65 {dimension_numbers = #tpu.dot_dimension_numbers<[1], [0], [0], [1], [0, 0, 1, 1], [], []>} : vector<1x16xf32>, vector<16x32xf32>, vector<1x32xf32> -> vector<1x32xf32>
    %171 = arith.mulf %4, %170 : vector<1x32xf32>
    %cst_66 = arith.constant dense<0.000000e+00> : vector<1xf32>
    %172 = vector.multi_reduction <add>, %171, %cst_66 [1] : vector<1x32xf32> to vector<1xf32>
    %173 = vector.shape_cast %172 : vector<1xf32> to vector<1x1xf32>
    %c4_i32_67 = arith.constant 4 : i32
    %174 = arith.muli %arg1, %c4_i32_67 : i32
    %c3_i32_68 = arith.constant 3 : i32
    %175 = arith.addi %174, %c3_i32_68 : i32
    %176 = arith.cmpi slt, %175, %6 : i32
    %cst_69 = arith.constant -1.000000e+30 : f32
    %177 = vector.broadcast %cst_69 : f32 to vector<1x1xf32>
    %178 = arith.select %176, %173, %177 : vector<1x1xf32>
    %179 = arith.maximumf %134, %178 : vector<1x1xf32>
    %180 = arith.subf %134, %179 : vector<1x1xf32>
    %181 = math.exp %180 : vector<1x1xf32>
    %182 = arith.subf %178, %179 : vector<1x1xf32>
    %183 = math.exp %182 : vector<1x1xf32>
    %184 = arith.mulf %181, %140 : vector<1x1xf32>
    %185 = arith.addf %184, %183 : vector<1x1xf32>
    %186 = vector.broadcast %181 : vector<1x1xf32> to vector<1x32xf32>
    %187 = arith.mulf %186, %145 : vector<1x32xf32>
    %188 = vector.broadcast %183 : vector<1x1xf32> to vector<1x32xf32>
    %189 = arith.mulf %188, %170 : vector<1x32xf32>
    %190 = arith.addf %187, %189 : vector<1x32xf32>
    %c0_70 = arith.constant 0 : index
    %c0_71 = arith.constant 0 : index
    %191 = vector.load %arg11[%c0_70, %c0_71] : memref<1x1xf32, #tpu.memory_space<vmem>>, vector<1x1xf32>
    tpu.vector_store %arg11[%c0_70, %c0_71], %179 {strides = array<i32>} : memref<1x1xf32, #tpu.memory_space<vmem>>, vector<1x1xf32>,
    %c0_72 = arith.constant 0 : index
    %c0_73 = arith.constant 0 : index
    %192 = vector.load %arg12[%c0_72, %c0_73] : memref<1x1xf32, #tpu.memory_space<vmem>>, vector<1x1xf32>
    tpu.vector_store %arg12[%c0_72, %c0_73], %185 {strides = array<i32>} : memref<1x1xf32, #tpu.memory_space<vmem>>, vector<1x1xf32>,
    %c0_74 = arith.constant 0 : index
    %c0_75 = arith.constant 0 : index
    %193 = vector.load %arg13[%c0_74, %c0_75] : memref<1x32xf32, #tpu.memory_space<vmem>>, vector<1x32xf32>
    tpu.vector_store %arg13[%c0_74, %c0_75], %190 {strides = array<i32>} : memref<1x32xf32, #tpu.memory_space<vmem>>, vector<1x32xf32>,
    %c1_i32_76 = arith.constant 1 : i32
    %194 = arith.cmpi eq, %arg1, %c1_i32_76 : i32
    %195 = arith.extui %194 : i1 to i32
    %c0_i32_77 = arith.constant 0 : i32
    %196 = arith.cmpi ne, %195, %c0_i32_77 : i32
    scf.if %196 {
      %c0_78 = arith.constant 0 : index
      %c0_79 = arith.constant 0 : index
      %197 = vector.load %arg13[%c0_78, %c0_79] : memref<1x32xf32, #tpu.memory_space<vmem>>, vector<1x32xf32>
      %c0_80 = arith.constant 0 : index
      %c0_81 = arith.constant 0 : index
      %198 = vector.load %arg12[%c0_80, %c0_81] : memref<1x1xf32, #tpu.memory_space<vmem>>, vector<1x1xf32>
      %199 = vector.broadcast %198 : vector<1x1xf32> to vector<1x32xf32>
      %200 = arith.divf %197, %199 : vector<1x32xf32>
      %c0_82 = arith.constant 0 : index
      %c0_83 = arith.constant 0 : index
      %c0_84 = arith.constant 0 : index
      %201 = vector.load %arg8[%c0_82, %c0_83, %c0_84] : memref<1x1x32xf32, #tpu.memory_space<vmem>>, vector<1x1x32xf32>
      %202 = vector.shape_cast %201 : vector<1x1x32xf32> to vector<1x32xf32>
      %203 = vector.shape_cast %200 : vector<1x32xf32> to vector<1x1x32xf32>
      tpu.vector_store %arg8[%c0_82, %c0_83, %c0_84], %203 {strides = array<i32>} : memref<1x1x32xf32, #tpu.memory_space<vmem>>, vector<1x1x32xf32>,
    } else {
    }
    return
  }
  func.func @transform_0(%arg0: i32, %arg1: i32, %arg2: memref<2x8xi32, #tpu.memory_space<smem>>, %arg3: memref<2xi32, #tpu.memory_space<smem>>) -> (i32, i32, i32) {
    %c0_i32 = arith.constant 0 : i32
    %c0_i32_0 = arith.constant 0 : i32
    %c0_i32_1 = arith.constant 0 : i32
    return %arg0, %c0_i32, %c0_i32_0 : i32, i32, i32
  }
  func.func @transform_1(%arg0: i32, %arg1: i32, %arg2: memref<2x8xi32, #tpu.memory_space<smem>>, %arg3: memref<2xi32, #tpu.memory_space<smem>>) -> (i32, i32, i32, i32) {
    %c0_i32 = arith.constant 0 : i32
    %c0_i32_0 = arith.constant 0 : i32
    %c0_i32_1 = arith.constant 0 : i32
    return %arg0, %arg1, %c0_i32, %c0_i32_0 : i32, i32, i32, i32
  }
  func.func @transform_2(%arg0: i32, %arg1: i32, %arg2: memref<2x8xi32, #tpu.memory_space<smem>>, %arg3: memref<2xi32, #tpu.memory_space<smem>>) -> (i32, i32) {
    %c0_i32 = arith.constant 0 : i32
    %c0_i32_0 = arith.constant 0 : i32
    %c0_i32_1 = arith.constant 0 : i32
    return %c0_i32, %c0_i32_0 : i32, i32
  }
  func.func @transform_3(%arg0: i32, %arg1: i32, %arg2: memref<2x8xi32, #tpu.memory_space<smem>>, %arg3: memref<2xi32, #tpu.memory_space<smem>>) -> (i32, i32) {
    %c0_i32 = arith.constant 0 : i32
    %c0_i32_0 = arith.constant 0 : i32
    %c0_i32_1 = arith.constant 0 : i32
    return %c0_i32, %c0_i32_0 : i32, i32
  }
  func.func @transform_4(%arg0: i32, %arg1: i32, %arg2: memref<2x8xi32, #tpu.memory_space<smem>>, %arg3: memref<2xi32, #tpu.memory_space<smem>>) -> (i32, i32, i32) {
    %c0_i32 = arith.constant 0 : i32
    %c0_i32_0 = arith.constant 0 : i32
    %c0_i32_1 = arith.constant 0 : i32
    return %arg0, %c0_i32, %c0_i32_0 : i32, i32, i32
  }
}

</mosaic_0001>

<bundles_post_ra>
// kernel: tpu_custom_call.1
= control target key start
LH: loop header
LB: loop body
LE: loop exit
PB: predicated region body
PF: predicated region fallthrough
CT: control target
= control target key end

     0   :  { %s1564_s27 = smov [#allocation8]   ;;  %s1565_s28 = smov [#allocation9]   ;;  %s2029_s0 = inlined_call_operand.hbm [shape: s32[2,8], index: 0, kind: input, shape index: {}]   ;;  %s2030_s2 = inlined_call_operand.hbm [shape: f32[2,1,32], index: 2, kind: input, shape index: {}]   ;;  %s2031_s3 = inlined_call_operand.hbm [shape: f32[2,8,16,32], index: 3, kind: input, shape index: {}]   ;;  %s2032_s4 = inlined_call_operand.hbm [shape: f32[32,32], index: 4, kind: input, shape index: {}]   ;;  %s2033_s5 = inlined_call_operand.hbm [shape: f32[32,32], index: 5, kind: input, shape index: {}]   ;;  %s2034_s6 = inlined_call_operand.hbm [shape: f32[2,1,32], index: 6, kind: output, shape index: {}]   ;;  %s2035_s1 = inlined_call_operand.hbm [shape: s32[2], index: 1, kind: input, shape index: {}]  }
   0x1   :  { %2050 = sst [smem:[#allocation35_spill]] %s2030_s2  ;;  %s12_s23 = sshll.u32 %s2029_s0, 4  ;;  %s13_s23 = int_to_ptr.hbm [resolvable:$true] %s12_s23 }
   0x2   :  { %2051 = sst [smem:[#allocation36_spill]] %s2032_s4  ;;  %s17_s26 = sshll.u32 %s2035_s1, 4  ;;  %s18_s26 = int_to_ptr.hbm [resolvable:$true] %s17_s26 }
   0x3   :  { %2052 = sst [smem:[#allocation37_spill]] %s2033_s5 }
   0x4   :  { %2053 = sst [smem:[#allocation38_spill]] %s2034_s6 }
   0x5   :  { %15 = dma.hbm_to_smem %s13_s23, 32, %s1564_s27, [#allocation7] }
   0x6   :  { %20 = dma.hbm_to_smem %s18_s26, 16, %s1565_s28, [#allocation7] }
   0x7   :  { %1498 = dma.done.wait [#allocation7], 48 }
   0x8   :  { %1499 = vsyncadd [#allocation7], 4294967248 }
   0x9   :  { %23 = sfence }
   0xa   :  { %24 = vsyncpa [#allocation11], 0 }
   0xb   :  { %26 = vsyncpa [#allocation11 + $0x1], 0 }
   0xc   :  { %27 = vsyncpa [#allocation14], 0 }
   0xd   :  { %29 = vsyncpa [#allocation14 + $0x1], 0 }
   0xe   :  { %30 = vsyncpa [#allocation17], 0 }
   0xf   :  { %31 = vsyncpa [#allocation12], 0 }
  0x10   :  { %33 = vsyncpa [#allocation12 + $0x1], 0  ;;  %s1615_s0 = smov 0   ;;  %s1617_s29 = smov 0  }
  0x11   :  { %s1619_s1 = smov 0   ;;  %s1621_s30 = smov 0  }
  0x12   :  { %s1623_s7 = smov 0   ;;  %s1625_s8 = smov 0  }
  0x13   :  { %s1627_s9 = smov 0   ;;  %s1629_s10 = smov 0  }
  0x14   :  { %s1631_s11 = smov 0   ;;  %s1633_s12 = smov 0  }
  0x15   :  { %s1635_s13 = smov 0  }
  0x16 LB: > { %2054 = sst [smem:[#allocation25_spill]] %s1530_s1  ;;  %s1671_s14 = sadd.s32 4294967295, %s1562_s13   ;;  %s1562_s13 = sphi %s1635_s13, %s39_s13   ;;  %s1558_s12 = sphi %s1633_s12, %s2098_s12   ;;  %s1554_s11 = sphi %s1631_s11, %s2097_s11   ;;  %s1550_s10 = sphi %s1629_s10, %s2096_s10   ;;  %s1546_s9 = sphi %s1627_s9, %s2095_s9   ;;  %s1542_s8 = sphi %s1625_s8, %s2088_s8   ;;  %s1538_s7 = sphi %s1623_s7, %s2094_s7   ;;  %s1534_s30 = sphi %s1621_s30, %s2093_s30   ;;  %s1530_s1 = sphi %s1619_s1, %s2086_s1   ;;  %s1526_s29 = sphi %s1617_s29, %s2092_s29   ;;  %s1522_s0 = sphi %s1615_s0, %s2091_s0  }
  0x17   : > { %2055 = sst [smem:[#allocation26_spill]] %s1534_s30  ;;  %p1061_p0 = scmp.ge.s32.totalorder %s1562_s13, 1 }
  0x18   : > { %2056 = sst [smem:[#allocation27_spill]] %s1542_s8  ;;  %p72_p1 = scmp.eq.s32.totalorder %s1671_s14, 0 }
  0x19   : > { %2057 = sst [smem:[#allocation28_spill]] %s1550_s10  ;;  %p178_p2 = scmp.lt.s32.totalorder %s1562_s13, 5 }
  0x1a   : > { %s2058_s4 = sld [smem:[#allocation36_spill]]  ;;  %s1566_s19 = smov [#allocation15]  }
  0x1b   : > { %p1679_p3 = pnand %p1061_p0, %p178_p2  ;;  %s191_s20 = sshll.u32 %s1566_s19, 4  ;;  %s192_s20 = int_to_ptr.vmem [resolvable:$true] %s191_s20 }
  0x1c   : > { %s2060_s5 = sld [smem:[#allocation37_spill]]  ;;  %s2036_s24 = smov 128  }
  0x1d   : > { %p1122_p4 = pneg %p1679_p3  ;;  %s2037_s25 = smov 8  }
  0x1e   : > { %s1569_s26 = smov [#allocation16]   ;;  %s1060_s28 = sadd.s32 4294967294, %s1562_s13  }
  0x1f   : > { %p1123_p5 = pnand %p1122_p4, %p72_p1  ;;  %s205_s27 = sshll.u32 %s1569_s26, 4  ;;  %s206_s27 = int_to_ptr.vmem [resolvable:$true] %s205_s27 }
  0x20   : > { %s189_s17 = sshll.u32 %s2058_s4, 4  ;;  %s48_s15 = sadd.s32 1, %s1554_s11  ;;  %s190_s17 = int_to_ptr.hbm [resolvable:$true] %s189_s17 }
  0x21   : > { %1125 = dma.hbm_to_vmem [thread:$0]  (!%p1123_p5), %s190_s17, 512, %s192_s20, [#allocation14], %s2036_s24, %s2036_s24, %s2037_s25  }
  0x22   : > { %s203_s23 = sshll.u32 %s2060_s5, 4  ;;  %p49_p6 = scmp.ge.s32.totalorder %s48_s15, 2  ;;  %s204_s23 = int_to_ptr.hbm [resolvable:$true] %s203_s23 }
  0x23   : > { %1128 = dma.hbm_to_vmem [thread:$0]  (!%p1123_p5), %s204_s23, 512, %s206_s27, [#allocation17], %s2036_s24, %s2036_s24, %s2037_s25  }
  0x24   : > { %s51_s16 = sadd.s32 1, %s1558_s12  ;;  %s58_s17 = sadd.s32 1, %s1542_s8 }
  0x25   : > { %p2039_p7 = scmp.ne.s32.totalorder %s1542_s8, %s1538_s7  ;;  %s2100_s15 = smov (%p49_p6, %s48_s15), 0 }
  0x26   : > { %2061 = sst [smem:[#allocation29_spill]] %s2100_s15  ;;  %s2102_s16 = smov (!%p49_p6, %s51_s16), %s1558_s12 }
  0x27   : > { %p66_p8 = scmp.eq.s32.totalorder %s1562_s13, 0  ;;  %p2038_p9 = scmp.ne.s32.totalorder %s1538_s7, %s1534_s30 }
  0x28   : > { %p53_p10 = scmp.ge.s32.totalorder %s2102_s16, 2  ;;  %s82_s19 = ssub.s32 %s1554_s11, %s2100_s15 }
  0x29   : > { %p1715_p11 = por %p66_p8, %p2039_p7  ;;  %p1724_p12 = por %p72_p1, %p2038_p9 }
  0x2a   : > { %s2104_s16 = smov (%p53_p10, %s2102_s16), 0  ;;  %s86_s22 = sadd.s32 1, %s1530_s1 }
  0x2b   : > { %2064 = sst [smem:[#allocation30_spill]] %s2104_s16  ;;  %p93_p13 = scmp.ne.s32.totalorder %s1530_s1, %s1526_s29 }
  0x2c   : > { %s55_s23 = ssub.s32 %s1558_s12, %s2104_s16  ;;  %p99_p0 = scmp.ne.s32.totalorder %s1526_s29, %s1522_s0 }
  0x2d   : > { %p56_p2 = scmp.eq.s32.totalorder %s55_s23, 0  ;;  %s83_s26 = sor.u32 %s82_s19, %s55_s23 }
  0x2e   : > { %p84_p4 = scmp.eq.s32.totalorder %s83_s26, 0  ;;  %p1739_p5 = por %p93_p13, %p66_p8 }
  0x2f   : > { %s1744_s24 = scalar_select %p56_p2, %s1542_s8, %s58_s17  }
  0x30   : > { %s1747_s25 = scalar_select %p84_p4, %s1530_s1, %s86_s22  }
  0x31   : > { %2066 = sst [smem:[#allocation31_spill]] %s1744_s24  ;;  %p1751_p6 = por %p99_p0, %p72_p1 }
  0x32   : > { %2067 = sst [smem:[#allocation32_spill]] %s1747_s25  ;;  %p165_p10 = scmp.eq.s32.totalorder %s1671_s14, 3 }
  0x33   : > { %p171_p9 = scmp.eq.s32.totalorder %s1060_s28, 3  ;;  %p1142_p7 = scmp.lt.s32.totalorder %s1562_s13, 4 }
  0x34   : > { %p2069_p8 = scmp.ne.s32.totalorder %s1542_s8, %s1538_s7  ;;  %s219_s17 = sand.u32 1, %s1542_s8  }
  0x35   : > { %p2072_p2 = scmp.ne.s32.totalorder %s1538_s7, %s1534_s30  ;;  %s2075_s2 = sld [smem:[#allocation35_spill]] }
  0x36   : > { %p1760_p13 = por %p165_p10, %p2069_p8  ;;  %s222_s5 = scalar_lea.vmem [#allocation10], %s219_s17 }
  0x37   : > { %p1768_p4 = por %p171_p9, %p2072_p2  ;;  %s229_s16 = sshll.u32 %s222_s5, 4  ;;  %s230_s16 = int_to_ptr.vmem [resolvable:$true] %s229_s16 }
  0x38   : > { %s2070_s0 = scalar_select %p1760_p13, 1, 0 }
  0x39   : > { %s2073_s19 = scalar_select %p1768_p4, 1, 0 }
  0x3a   : > { %2071 = sst [smem:[#allocation33_spill]] %s2070_s0  ;;  %p1130_p0 = pnand %p1142_p7, %p1715_p11 }
  0x3b   : > { %2074 = sst [smem:[#allocation34_spill]] %s2073_s19  ;;  %s225_s26 = scalar_lea.hbm %s2075_s2, %s1558_s12 }
  0x3c   : > { %s227_s28 = sshll.u32 %s225_s26, 4  ;;  %p1780_p10 = pnand %p1142_p7, %p1739_p5  ;;  %s228_s28 = int_to_ptr.hbm [resolvable:$true] %s227_s28 }
  0x3d   : > { %s238_s24 = sand.u32 1, %s1530_s1   ;;  %s220_s8 = scalar_lea.sflag [#allocation11], %s219_s17 }
  0x3e   : > { %1132 = dma.hbm_to_vmem [thread:$0]  (!%p1130_p0), %s228_s28, 16, %s230_s16, %s220_s8  }
  0x3f   : > { %s236_s25 = sand.u32 1, %s1562_s13   ;;  %s1065_s19 = sshll.u32 %s238_s24, 6 }
  0x40   : > { %s1107_s22 = sshll.u32 %s1554_s11, 3  ;;  %s1068_s23 = sshll.u32 %s1558_s12, 4 }
  0x41   : > { %s240_s26 = scalar_lea.vmem [#allocation13], %s1065_s19  ;;  %s246_s5 = sadd.s32 %s1107_s22, %s1068_s23 }
  0x42   : > { %s251_s2 = sshll.u32 %s240_s26, 4  ;;  %s1069_s30 = sshll.u32 %s246_s5, 3  ;;  %s252_s2 = int_to_ptr.vmem [resolvable:$true] %s251_s2 }
  0x43   : > { %s248_s27 = scalar_lea.hbm %s2031_s3, %s1069_s30  ;;  %s237_s10 = scalar_lea.sflag [#allocation14], %s236_s25 }
  0x44   : > { %s249_s6 = sshll.u32 %s248_s27, 4  ;;  %s2077_s1 = smov 8   ;;  %s250_s6 = int_to_ptr.hbm [resolvable:$true] %s249_s6 }
  0x45   : > { %s2078_s17 = smov 128   ;;  %263 = sbr.rel (%p1679_p3) target bundleno = 1581 (0x62d), region = 36 }
  0x46   : > { %1135 = dma.hbm_to_vmem [thread:$0]  (!%p1780_p10), %s250_s6, 1024, %s252_s2, %s237_s10, %s2078_s17, %s2078_s17, %s2077_s1  }
  0x47   : > { %s1799_s8 = sand.u32 (!%p1679_p3), 1, %s1538_s7  }
  0x48   : > { %s266_s24 = scalar_lea.sflag (!%p1679_p3), [#allocation11], %s1799_s8  ;;  %s268_s30 = scalar_lea.vmem (!%p1679_p3), [#allocation10], %s1799_s8 }
  0x4a   : > { %1501 = dma.done.wait (%p1724_p12), %s266_s24, 16  }
  0x4b   : > { %1503 = vsyncadd (%p1724_p12), %s266_s24, 4294967280  ;;  %s274_s2 = sand.u32 1, %s1671_s14   ;;  %s276_s6 = sand.u32 1, %s1526_s29  }
  0x4c   : > { %s1071_s1 = sshll.u32 %s276_s6, 6  ;;  %s275_s10 = scalar_lea.sflag [#allocation14], %s274_s2 }
  0x4d   : > { %s1809_s18 = scalar_lea.vmem [#allocation13], %s1071_s1 }
  0x4e   : > { %1505 = dma.done.wait (%p1751_p6), %s275_s10, 1024  }
  0x4f   : > { %1507 = vsyncadd (%p1751_p6), %s275_s10, 4294966272 }
  0x50   : > { %1509 = dma.done.wait (%p72_p1), [#allocation14], 512  }
  0x51   : > { %1511 = vsyncadd (%p72_p1), [#allocation14], 4294966784 }
  0x52   : > { %1513 = dma.done.wait (%p72_p1), [#allocation17], 512  }
  0x53   : > { %1515 = vsyncadd (%p72_p1), [#allocation17], 4294966784  ;;  %s316_s25 = scalar_lea.vmem [#allocation18], %s1799_s8  ;;  %p1074_p3 = scmp.ne.s32.totalorder %s1546_s9, 0 }
  0x55   : > { %321 = sbr.rel (%p1074_p3) target bundleno = 226 (0xe2), region = 56 }
  0x5a   : > { %v326_v0 = vld [vmem:[#allocation15 + $0x18] sm:$0xff]  ;;  %v325_v2 = vld [vmem:[#allocation15 + $0x10] sm:$0xff]  ;;  %v324_v4 = vld [vmem:[#allocation15 + $0x8] sm:$0xff]  ;;  %vm327_vm0 = vcmask 261120   ;;  %vm351_vm1 = vcmask 253952   ;;  %vm378_vm2 = vcmask 0  }
  0x5b   : > { %v356_v1 = vld [vmem:[#allocation16 + $0x18] sm:$0xff]  ;;  %343 = vmatpush.msra.mxu0 %v326_v0  ;;  %v355_v3 = vld [vmem:[#allocation16 + $0x10] sm:$0xff]  ;;  %v354_v5 = vld [vmem:[#allocation16 + $0x8] sm:$0xff]  ;;  %v1570_v9 = vmov -inf   ;;  %v1571_v10 = vmov 0.0  }
  0x5c   : > { %369 = vmatpush.msra.mxu1 %v356_v1  ;;  %v323_v6 = vld [vmem:[#allocation15] sm:$0xff]  ;;  %v322_v8 = vld [vmem:[%s268_s30] sm:$0x1]  ;;  %379 = vst.msk [vmem:[#allocation4] sm:$0x1] %vm378_vm2, %v1570_v9 }
  0x5d   : > { %344 = vmatpush.msra.mxu0 %v325_v2  ;;  %v353_v7 = vld [vmem:[#allocation16] sm:$0xff]  ;;  %380 = vst.msk [vmem:[#allocation5] sm:$0x1] %vm378_vm2, %v1571_v10 }
  0x5e   : > { %370 = vmatpush.msra.mxu1 %v355_v3  ;;  %381 = vst.msk [vmem:[#allocation6] sm:$0x1] %vm351_vm1, %v1571_v10 }
  0x5f   : > { %345 = vmatpush.msra.mxu0 %v324_v4 }
  0x60   : > { %371 = vmatpush.msra.mxu1 %v354_v5 }
  0x61   : > { %346 = vmatpush.msra.mxu0 %v323_v6 }
  0x62   : > { %372 = vmatpush.msra.mxu1 %v353_v7  ;;  %1075 = vmatmul.msk.f32.vlgmr.msra.gmra.mxu0 %vm327_vm0, %v322_v8 }
  0x63   : > { %1076 = vmatmul.msk.f32.vlgmr.msra.gmra.mxu1 %vm327_vm0, %v322_v8 }
  0xdf   : > { %v348_v11 = vpop.f32.mrf.mxu0 }
  0xe0   : > { %v374_v12 = vpop.f32.mrf.mxu1  ;;  %352 = vst.msk [vmem:[#allocation2] sm:$0x1] %vm351_vm1, %v348_v11 }
  0xe1   : > { %377 = vst.msk [vmem:[#allocation3] sm:$0x1] %vm351_vm1, %v374_v12 }
  0xe2 PF: > { %v391_v13 = vld [vmem:[%s1809_s18 + $0x8] sm:$0xff]  ;;  %vm401_vm3 = vcmask 261120   ;;  %v1084_v14 = vld [vmem:[%s1809_s18 + $0x18] sm:$0xff]  ;;  %v390_v15 = vld [vmem:[%s1809_s18] sm:$0xff]  ;;  %s2079_s4 = sld [smem:[#allocation28_spill]]  ;;  %s1848_s14 = sshll.u32 %s1546_s9, 2  ;;  %v388_v20 = vlaneseq }
  0xe3   : > { %1079 = vmatpush.xpose.msk.msra.mxu0 %vm401_vm3, %v391_v13  ;;  %1086 = vmatpush.xpose.msk.msra.mxu2 %vm401_vm3, %v1084_v14  ;;  %v1083_v16 = vld [vmem:[%s1809_s18 + $0x10] sm:$0xff]  ;;  %v1098_v17 = vld [vmem:[%s1809_s18 + $0x38] sm:$0xff]  ;;  %s393_s15 = sshra.s32 %s1848_s14, 7  ;;  %s1853_s21 = sadd.s32 1, %s1848_s14  ;;  %vm434_vm5 = vcmask 122880   ;;  %v1091_v44 = vld [vmem:[%s1809_s18 + $0x28] sm:$0xff] }
  0xe4   : > { %482 = vmatpush.msra.mxu1 %v391_v13  ;;  %608 = vmatpush.msra.mxu3 %v1084_v14  ;;  %v1097_v19 = vld [vmem:[%s1809_s18 + $0x30] sm:$0xff]  ;;  %s398_s19 = sand.u32 127, %s1848_s14  ;;  %s525_s28 = sshra.s32 %s1853_s21, 7  ;;  %v1863_v21 = vand.u32 127, %v388_v20  ;;  %v1090_v45 = vld [vmem:[%s1809_s18 + $0x20] sm:$0xff]  ;;  %vm464_vm15 = vcmask 130048  }
  0xe5   : > { %s530_s20 = sand.u32 127, %s1853_s21  ;;  %s1872_s24 = sadd.s32 3, %s1848_s14 }
  0xe6   : > { %483 = vmatpush.msra.mxu1 %v390_v15  ;;  %609 = vmatpush.msra.mxu3 %v1083_v16  ;;  %s775_s30 = sshra.s32 %s1872_s24, 7  ;;  %s780_s1 = sand.u32 127, %s1872_s24 }
  0xe7   : > { %1080 = vmatpush.xpose.msk.msra.mxu0 %vm401_vm3, %v390_v15  ;;  %1087 = vmatpush.xpose.msk.msra.mxu2 %vm401_vm3, %v1083_v16  ;;  %v1836_v18 = vld [vmem:[#allocation2] sm:$0x1]  ;;  %p1104_p2 = scmp.ne.s32.totalorder %s1546_s9, 1 }
  0xe8   : > { %s395_s16 = sadd.s32 %s2079_s4, %s393_s15  ;;  %s527_s23 = sadd.s32 %s2079_s4, %s525_s28  ;;  %1093 = vmatpush.xpose.msk.msrb.mxu1 %vm401_vm3, %v1091_v44  ;;  %733 = vmatpush.msrb.mxu3 %v1091_v44  ;;  %v1908_v11 = vld [vmem:[#allocation3] sm:$0x1] }
  0xe9   : > { %s1078_s0 = sshll.u32 %s395_s16, 7  ;;  %s1085_s5 = sshll.u32 %s527_s23, 7 }
  0xea   : > { %1081 = vmatmul.msk.f32.vlgmr.msra.gmra.mxu0 %vm401_vm3, %v1836_v18  ;;  %1088 = vmatmul.msk.f32.vlgmr.msra.gmra.mxu2 %vm401_vm3, %v1836_v18  ;;  %s399_s22 = sadd.s32 %s1078_s0, %s398_s19  ;;  %s531_s27 = sadd.s32 %s1085_s5, %s530_s20 }
  0xeb   : > { %1100 = vmatpush.xpose.msk.msrb.mxu0 %vm401_vm3, %v1098_v17  ;;  %858 = vmatpush.msrb.mxu2 %v1098_v17  ;;  %s1858_s26 = sld [smem:[#allocation8 + %s399_s22]]  ;;  %s777_s2 = sadd.s32 %s2079_s4, %s775_s30 }
  0xec   : > { %s1861_s17 = sld [smem:[#allocation8 + %s531_s27]]  ;;  %s1099_s6 = sshll.u32 %s777_s2, 7  ;;  %734 = vmatpush.msrb.mxu3 %v1090_v45  ;;  %1094 = vmatpush.xpose.msk.msrb.mxu1 %vm401_vm3, %v1090_v45 }
  0xed   : > { %859 = vmatpush.msrb.mxu2 %v1097_v19  ;;  %s781_s10 = sadd.s32 %s1099_s6, %s780_s1  ;;  %s1901_s0 = sadd.s32 2, %s1848_s14 }
  0xee   : > { %s1877_s15 = sld [smem:[#allocation8 + %s781_s10]]  ;;  %s650_s19 = sshra.s32 %s1901_s0, 7 }
  0xef   : > { %1101 = vmatpush.xpose.msk.msrb.mxu0 %vm401_vm3, %v1097_v19  ;;  %s652_s28 = sadd.s32 %s2079_s4, %s650_s19  ;;  %s655_s23 = sand.u32 127, %s1901_s0 }
  0xf0   : > { %s1092_s22 = sshll.u32 %s652_s28, 7  ;;  %s1929_s20 = sld [smem:[#allocation9 + %s2079_s4]] }
  0xf1   : > { %v431_v22 = vstv %s1858_s26  ;;  %p459_p1 = scmp.gt.s32.totalorder %s1858_s26, 0  ;;  %s656_s26 = sadd.s32 %s1092_s22, %s655_s23 }
  0xf2   : > { %1102 = vmatmul.msk.f32.vlgmr.msrb.gmra.mxu0 %vm401_vm3, %v1836_v18  ;;  %vm432_vm4 = vcmp.lt.s32.totalorder %v1863_v21, %v431_v22  ;;  %v559_v25 = vstv %s1861_s17  ;;  %p586_p7 = scmp.gt.s32.totalorder %s1861_s17, 0  ;;  %s1906_s5 = sld [smem:[#allocation8 + %s656_s26]] }
  0xf3   : > { %vm560_vm6 = vcmp.lt.s32.totalorder %v1863_v21, %v559_v25  ;;  %s460_s16 = scalar_select %p459_p1, 1, 0 }
  0xf4   : > { %v809_v30 = vstv %s1877_s15  ;;  %s587_s18 = scalar_select %p586_p7, 1, 0 }
  0xf5   : > { %vm810_vm7 = vcmp.lt.s32.totalorder %v1863_v21, %v809_v30  ;;  %v461_v58 = vstv %s460_s16  ;;  %p836_p12 = scmp.gt.s32.totalorder %s1877_s15, 0 }
  0xf6   : > { %vm462_vm14 = vcmp.eq.s32.totalorder %v461_v58, 1  ;;  %v588_v6 = vstv %s587_s18  ;;  %p493_p9 = scmp.lt.s32.totalorder %s1848_s14, %s1929_s20  ;;  %p618_p11 = scmp.lt.s32.totalorder %s1853_s21, %s1929_s20 }
  0xf7   : > { %vm589_vm2 = vcmp.eq.s32.totalorder %v588_v6, 1  ;;  %s837_s4 = scalar_select %p836_p12, 1, 0 }
  0xf8   : > { %v684_v17 = vstv %s1906_s5  ;;  %s494_s27 = scalar_select %p493_p9, 1, 0 }
  0xf9   : > { %s619_s17 = scalar_select %p618_p11, 1, 0 }
  0xfa   : > { %p711_p5 = scmp.gt.s32.totalorder %s1906_s5, 0  ;;  %p743_p6 = scmp.lt.s32.totalorder %s1901_s0, %s1929_s20 }
  0xfb   : > { %p868_p8 = scmp.lt.s32.totalorder %s1872_s24, %s1929_s20 }
  0xfc   : > { %s712_s14 = scalar_select %p711_p5, 1, 0 }
  0xfd   : > { %s744_s21 = scalar_select %p743_p6, 1, 0 }
  0xfe   : > { %s869_s30 = scalar_select %p868_p8, 1, 0 }
 0x167   : > { %v428_v23 = vpop.f32.mrf.mxu0 }
 0x168   : > { %v433_v24 = vsel %vm432_vm4, %v428_v23, -1e+30  ;;  %vm489_vm4 = vcmask 253952  }
 0x169   : > { %v435_v26 = vsel %vm434_vm5, %v433_v24, -inf }
 0x16a   : > { %436 = vmax.xlane.f32.xlu0 %v435_v26  ;;  %v1572_v26 = vmov 0  }
 0x16b   : > { %1245 = vset.pattern.permute.xlu1 %v1572_v26  ;;  %1244 = vset.pattern.permute.xlu0 %v1572_v26 }
 0x16c   : > { %1246 = vset.pattern.permute.xlu2 %v1572_v26 }
 0x16d   : > { %v556_v27 = vpop.f32.mrf.mxu2 }
 0x16e   : > { %v561_v28 = vsel %vm560_vm6, %v556_v27, -1e+30  ;;  %v495_v27 = vstv %s494_s27 }
 0x16f   : > { %v562_v29 = vsel %vm434_vm5, %v561_v28, -inf  ;;  %v806_v31 = vpop.f32.mrf.mxu0  ;;  %vm496_vm6 = vcmp.eq.s32.totalorder %v495_v27, 1 }
 0x170   : > { %563 = vmax.xlane.f32.xlu1 %v562_v29  ;;  %v1881_v32 = vsel %vm810_vm7, %v806_v31, -1e+30 }
 0x171   : > { %v812_v33 = vsel %vm434_vm5, %v1881_v32, -inf }
 0x172   : > { %813 = vmax.xlane.f32.xlu2 %v812_v33 }
 0x1dd   : > { %v437_v34 = vpop.xlane.xlu0 %436 }
 0x1de   : > { %v438_v35 = vsub.f32 %v433_v24, %v437_v34 }
 0x1e0   : > { %v439_v36 = vmul.f32 1.442695, %v438_v35 }
 0x1e2   : > { %1247 = vpow2.f32 %v439_v36 }
 0x1e3   : > { %v564_v37 = vpop.xlane.xlu1 %563 }
 0x1e4   : > { %v565_v38 = vsub.f32 %v561_v28, %v564_v37  ;;  %v385_v28 = vld [vmem:[#allocation4] sm:$0x1]  ;;  %v620_v37 = vstv %s619_s17 }
 0x1e5   : > { %v814_v46 = vpop.xlane.xlu2 %813  ;;  %vm621_vm7 = vcmp.eq.s32.totalorder %v620_v37, 1 }
 0x1e6   : > { %v566_v39 = vmul.f32 1.442695, %v565_v38  ;;  %v815_v12 = vsub.f32 %v1881_v32, %v814_v46 }
 0x1e8   : > { %v1248_v40 = vpop.eup %1247  ;;  %1249 = vpow2.f32 %v566_v39  ;;  %v816_v15 = vmul.f32 1.442695, %v815_v12 }
 0x1e9   : > { %v441_v41 = vsel %vm434_vm5, %v1248_v40, 0.0 }
 0x1ea   : > { %442 = vadd.xlane.f32.xlu0 %v441_v41 }
 0x1ee   : > { %v1250_v42 = vpop.eup %1249 }
 0x1ef   : > { %v568_v43 = vsel %vm434_vm5, %v1250_v42, 0.0 }
 0x1f0   : > { %569 = vadd.xlane.f32.xlu2 %v568_v43 }
 0x25d   : > { %v443_v47 = vpop.xlane.xlu0 %442 }
 0x25e   : > { %1251 = vrcp.f32 %v443_v47  ;;  %v455_v52 = vand.u32 2147483648, %v443_v47  ;;  %v453_v53 = vand.u32 2147483647, %v443_v47  ;;  %vm449_vm9 = vweird.f32 %v443_v47 }
 0x260   : > { %v456_v59 = vor.u32 1.1754944e-38, %v455_v52  ;;  %vm454_vm12 = vcmp.eq.f32.partialorder %v453_v53, 8.507059e+37 }
 0x263   : > { %v570_v48 = vpop.xlane.xlu2 %569 }
 0x264   : > { %v1252_v49 = vpop.eup %1251  ;;  %1253 = vrcp.f32 %v570_v48  ;;  %vm576_vm10 = vweird.f32 %v570_v48  ;;  %v582_v60 = vand.u32 2147483648, %v570_v48  ;;  %v580_v63 = vand.u32 2147483647, %v570_v48 }
 0x265   : > { %v445_v50 = vmul.f32 %v1252_v49, %v443_v47  ;;  %vm450_vm8 = vweird.f32 %v1252_v49  ;;  %1255 = vpow2.f32 %v816_v15 }
 0x266   : > { %vm451_vm11 = vmor %vm449_vm9, %vm450_vm8  ;;  %v583_v3 = vor.u32 1.1754944e-38, %v582_v60  ;;  %vm581_vm1 = vcmp.eq.f32.partialorder %v580_v63, 8.507059e+37 }
 0x267   : > { %v446_v51 = vsub.f32 1.0, %v445_v50 }
 0x269   : > { %v447_v54 = vmul.f32 %v1252_v49, %v446_v51 }
 0x26a   : > { %v1254_v55 = vpop.eup %1253 }
 0x26b   : > { %v572_v56 = vmul.f32 %v1254_v55, %v570_v48  ;;  %v448_v57 = vadd.f32 %v1252_v49, %v447_v54  ;;  %vm577_vm13 = vweird.f32 %v1254_v55  ;;  %v1921_v23 = vpop.eup %1255 }
 0x26c   : > { %vm578_vm0 = vmor %vm576_vm10, %vm577_vm13 }
 0x26d   : > { %v573_v61 = vsub.f32 1.0, %v572_v56  ;;  %v452_v62 = vsel %vm451_vm11, %v1252_v49, %v448_v57 }
 0x26e   : > { %v457_v0 = vsel %vm454_vm12, %v456_v59, %v452_v62 }
 0x26f   : > { %v574_v1 = vmul.f32 %v1254_v55, %v573_v61  ;;  %v458_v2 = vmul.f32 %v1248_v40, %v457_v0  ;;  %v386_v40 = vld [vmem:[#allocation5] sm:$0x1] }
 0x271   : > { %v463_v4 = vsel %vm462_vm14, %v458_v2, 0.0  ;;  %v575_v5 = vadd.f32 %v1254_v55, %v574_v1 }
 0x272   : > { %1082 = vmatmul.msk.f32.vlgmr.msra.gmra.mxu1 %vm464_vm15, %v463_v4 }
 0x273   : > { %v579_v7 = vsel %vm578_vm0, %v1254_v55, %v575_v5 }
 0x274   : > { %v584_v8 = vsel %vm581_vm1, %v583_v3, %v579_v7  ;;  %v838_v3 = vstv %s837_s4 }
 0x275   : > { %v585_v9 = vmul.f32 %v1250_v42, %v584_v8  ;;  %vm839_vm11 = vcmp.eq.s32.totalorder %v838_v3, 1 }
 0x277   : > { %v590_v10 = vsel %vm589_vm2, %v585_v9, 0.0 }
 0x278   : > { %1089 = vmatmul.msk.f32.vlgmr.msra.gmra.mxu3 %vm464_vm15, %v590_v10 }
 0x27a   : > { %1095 = vmatmul.msk.f32.vlgmr.msrb.gmra.mxu1 %vm401_vm3, %v1836_v18  ;;  %vm685_vm3 = vcmp.lt.s32.totalorder %v1863_v21, %v684_v17  ;;  %v818_v21 = vsel %vm434_vm5, %v1921_v23, 0.0 }
 0x2ef   : > { %v1911_v13 = vpop.f32.mrf.mxu1 }
 0x2f0   : > { %v488_v14 = vmul.f32 %v1911_v13, %v1908_v11 }
 0x2f2   : > { %v490_v16 = vsel %vm489_vm4, %v488_v14, 0.0 }
 0x2f3   : > { %491 = vadd.xlane.f32.xlu2 %v490_v16 }
 0x2f7   : > { %v681_v18 = vpop.f32.mrf.mxu1 }
 0x2f8   : > { %v686_v19 = vsel %vm685_vm3, %v681_v18, -1e+30  ;;  %v713_v18 = vstv %s712_s14  ;;  %vm896_vm3 = vcmask 0  }
 0x2f9   : > { %v687_v20 = vsel %vm434_vm5, %v686_v19, -inf  ;;  %vm714_vm1 = vcmp.eq.s32.totalorder %v713_v18, 1 }
 0x2fa   : > { %688 = vmax.xlane.f32.xlu1 %v687_v20 }
 0x2fb   : > { %v1919_v22 = vpop.f32.mrf.mxu3 }
 0x2fc   : > { %v614_v24 = vmul.f32 %v1919_v22, %v1908_v11 }
 0x2fe   : > { %v615_v25 = vsel %vm489_vm4, %v614_v24, 0.0 }
 0x2ff   : > { %616 = vadd.xlane.f32.xlu2 %v615_v25 }
 0x302   : > { %819 = vadd.xlane.f32.xlu1 %v818_v21 }
 0x366   : > { %v492_v29 = vpop.xlane.xlu2 %491 }
 0x367   : > { %v497_v30 = vsel %vm496_vm6, %v492_v29, -1e+30 }
 0x368   : > { %v498_v31 = vmax.f32 %v385_v28, %v497_v30 }
 0x36a   : > { %v499_v32 = vsub.f32 %v385_v28, %v498_v31  ;;  %v502_v33 = vsub.f32 %v497_v30, %v498_v31 }
 0x36c   : > { %v500_v34 = vmul.f32 1.442695, %v499_v32  ;;  %v503_v35 = vmul.f32 1.442695, %v502_v33 }
 0x36d   : > { %v689_v36 = vpop.xlane.xlu1 %688 }
 0x36e   : > { %1257 = vpow2.f32 %v500_v34  ;;  %v690_v38 = vsub.f32 %v686_v19, %v689_v36 }
 0x36f   : > { %1259 = vpow2.f32 %v503_v35  ;;  %v870_v35 = vstv %s869_s30 }
 0x370   : > { %v691_v39 = vmul.f32 1.442695, %v690_v38  ;;  %vm871_vm2 = vcmp.eq.s32.totalorder %v870_v35, 1 }
 0x372   : > { %1261 = vpow2.f32 %v691_v39  ;;  %v617_v41 = vpop.xlane.xlu2 %616 }
 0x373   : > { %v622_v42 = vsel %vm621_vm7, %v617_v41, -1e+30 }
 0x374   : > { %v1258_v43 = vpop.eup %1257  ;;  %v1935_v44 = vmax.f32 %v498_v31, %v622_v42 }
 0x375   : > { %v1260_v45 = vpop.eup %1259  ;;  %v505_v46 = vmul.f32 %v1258_v43, %v386_v40  ;;  %v820_v47 = vpop.xlane.xlu1 %819 }
 0x376   : > { %v624_v48 = vsub.f32 %v498_v31, %v1935_v44  ;;  %v627_v49 = vsub.f32 %v622_v42, %v1935_v44  ;;  %1263 = vrcp.f32 %v820_v47  ;;  %516 = vperm.xlu1 %1245, %v1260_v45   ;;  %v832_v57 = vand.u32 2147483648, %v820_v47 }
 0x377   : > { %v506_v50 = vadd.f32 %v1260_v45, %v505_v46  ;;  %vm826_vm8 = vweird.f32 %v820_v47  ;;  %v830_v63 = vand.u32 2147483647, %v820_v47  ;;  %v745_v31 = vstv %s744_s21 }
 0x378   : > { %v1262_v51 = vpop.eup %1261  ;;  %v625_v52 = vmul.f32 1.442695, %v624_v48  ;;  %v628_v53 = vmul.f32 1.442695, %v627_v49  ;;  %v833_v0 = vor.u32 1.1754944e-38, %v832_v57 }
 0x379   : > { %v693_v54 = vsel %vm434_vm5, %v1262_v51, 0.0  ;;  %vm831_vm10 = vcmp.eq.f32.partialorder %v830_v63, 8.507059e+37  ;;  %v387_v57 = vld [vmem:[#allocation6] sm:$0x1] }
 0x37a   : > { %1265 = vpow2.f32 %v625_v52  ;;  %694 = vadd.xlane.f32.xlu0 %v693_v54 }
 0x37b   : > { %1267 = vpow2.f32 %v628_v53 }
 0x37c   : > { %v1264_v55 = vpop.eup %1263 }
 0x37d   : > { %v822_v56 = vmul.f32 %v1264_v55, %v820_v47  ;;  %vm827_vm9 = vweird.f32 %v1264_v55 }
 0x37e   : > { %vm828_vm5 = vmor %vm826_vm8, %vm827_vm9 }
 0x37f   : > { %v823_v58 = vsub.f32 1.0, %v822_v56 }
 0x380   : > { %v1266_v59 = vpop.eup %1265 }
 0x381   : > { %v1268_v60 = vpop.eup %1267  ;;  %v630_v61 = vmul.f32 %v1266_v59, %v506_v50  ;;  %v824_v62 = vmul.f32 %v1264_v55, %v823_v58 }
 0x382   : > { %641 = vperm.xlu1 %1245, %v1268_v60  }
 0x383   : > { %v1941_v1 = vadd.f32 %v1268_v60, %v630_v61  ;;  %v825_v2 = vadd.f32 %v1264_v55, %v824_v62 }
 0x385   : > { %v829_v4 = vsel %vm828_vm5, %v1264_v55, %v825_v2 }
 0x386   : > { %v834_v5 = vsel %vm831_vm10, %v833_v0, %v829_v4 }
 0x387   : > { %v835_v6 = vmul.f32 %v1921_v23, %v834_v5 }
 0x389   : > { %v840_v7 = vsel %vm839_vm11, %v835_v6, 0.0 }
 0x38a   : > { %1103 = vmatmul.msk.f32.vlgmr.msrb.gmra.mxu2 %vm464_vm15, %v840_v7 }
 0x38e   : > { %509 = vperm.xlu0 %1244, %v1258_v43  }
 0x3e8   : > { %v517_v54 = vpop.permute.xlu1 %516 }
 0x3e9   : > { %v519_v61 = vmul.f32 %v517_v54, %v1911_v13 }
 0x3ed   : > { %v695_v8 = vpop.xlane.xlu0 %694 }
 0x3ee   : > { %1269 = vrcp.f32 %v695_v8  ;;  %v707_v14 = vand.u32 2147483648, %v695_v8  ;;  %v705_v16 = vand.u32 2147483647, %v695_v8  ;;  %vm701_vm13 = vweird.f32 %v695_v8 }
 0x3f0   : > { %v708_v19 = vor.u32 1.1754944e-38, %v707_v14  ;;  %vm706_vm0 = vcmp.eq.f32.partialorder %v705_v16, 8.507059e+37 }
 0x3f4   : > { %v1270_v9 = vpop.eup %1269  ;;  %v642_v58 = vpop.permute.xlu1 %641 }
 0x3f5   : > { %v697_v10 = vmul.f32 %v1270_v9, %v695_v8  ;;  %vm702_vm12 = vweird.f32 %v1270_v9  ;;  %v644_v2 = vmul.f32 %v642_v58, %v1919_v22 }
 0x3f6   : > { %vm703_vm14 = vmor %vm701_vm13, %vm702_vm12 }
 0x3f7   : > { %v698_v12 = vsub.f32 1.0, %v697_v10 }
 0x3f9   : > { %v699_v15 = vmul.f32 %v1270_v9, %v698_v12 }
 0x3fb   : > { %v700_v17 = vadd.f32 %v1270_v9, %v699_v15 }
 0x3fd   : > { %v704_v20 = vsel %vm703_vm14, %v1270_v9, %v700_v17 }
 0x3fe   : > { %v709_v23 = vsel %vm706_vm0, %v708_v19, %v704_v20 }
 0x3ff   : > { %v710_v24 = vmul.f32 %v1262_v51, %v709_v23 }
 0x400   : > { %v510_v55 = vpop.permute.xlu0 %509 }
 0x401   : > { %v715_v25 = vsel %vm714_vm1, %v710_v24, 0.0  ;;  %v512_v56 = vperm.slane %v510_v55, 0 }
 0x402   : > { %1096 = vmatmul.msk.f32.vlgmr.msrb.gmra.mxu3 %vm464_vm15, %v715_v25  ;;  %vm746_vm15 = vcmp.eq.s32.totalorder %v745_v31, 1 }
 0x403   : > { %v513_v60 = vmul.f32 %v512_v56, %v387_v57 }
 0x405   : > { %v520_v63 = vadd.f32 %v519_v61, %v513_v60 }
 0x40d   : > { %v1952_v28 = vpop.f32.mrf.mxu2 }
 0x40e   : > { %v864_v29 = vmul.f32 %v1952_v28, %v1908_v11 }
 0x410   : > { %v865_v30 = vsel %vm489_vm4, %v864_v29, 0.0 }
 0x485   : > { %v1947_v21 = vpop.f32.mrf.mxu3 }
 0x486   : > { %v739_v26 = vmul.f32 %v1947_v21, %v1908_v11 }
 0x488   : > { %v740_v27 = vsel %vm489_vm4, %v739_v26, 0.0 }
 0x489   : > { %741 = vadd.xlane.f32.xlu2 %v740_v27 }
 0x491   : > { %866 = vadd.xlane.f32.xlu2 %v865_v30 }
 0x4a9   : > { %634 = vperm.xlu2 %1246, %v1266_v59  }
 0x4fc   : > { %v742_v32 = vpop.xlane.xlu2 %741 }
 0x4fd   : > { %v747_v33 = vsel %vm746_vm15, %v742_v32, -1e+30 }
 0x4fe   : > { %v748_v34 = vmax.f32 %v1935_v44, %v747_v33 }
 0x500   : > { %v749_v36 = vsub.f32 %v1935_v44, %v748_v34  ;;  %v752_v37 = vsub.f32 %v747_v33, %v748_v34 }
 0x502   : > { %v750_v38 = vmul.f32 1.442695, %v749_v36  ;;  %v753_v11 = vmul.f32 1.442695, %v752_v37 }
 0x504   : > { %1271 = vpow2.f32 %v750_v38  ;;  %v867_v39 = vpop.xlane.xlu2 %866 }
 0x505   : > { %1273 = vpow2.f32 %v753_v11  ;;  %v872_v40 = vsel %vm871_vm2, %v867_v39, -1e+30 }
 0x506   : > { %v873_v41 = vmax.f32 %v748_v34, %v872_v40 }
 0x508   : > { %v874_v42 = vsub.f32 %v748_v34, %v873_v41  ;;  %v877_v43 = vsub.f32 %v872_v40, %v873_v41  ;;  %897 = vst.msk [vmem:[#allocation4] sm:$0x1] %vm896_vm3, %v873_v41 }
 0x50a   : > { %v1272_v45 = vpop.eup %1271  ;;  %v875_v46 = vmul.f32 1.442695, %v874_v42  ;;  %v878_v47 = vmul.f32 1.442695, %v877_v43 }
 0x50b   : > { %v1274_v48 = vpop.eup %1273  ;;  %759 = vperm.xlu1 %1245, %v1272_v45   ;;  %v755_v44 = vmul.f32 %v1272_v45, %v1941_v1 }
 0x50c   : > { %1275 = vpow2.f32 %v875_v46  ;;  %766 = vperm.xlu0 %1244, %v1274_v48   ;;  %v635_v59 = vpop.permute.xlu2 %634 }
 0x50d   : > { %1277 = vpow2.f32 %v878_v47  ;;  %v756_v49 = vadd.f32 %v1274_v48, %v755_v44  ;;  %v637_v62 = vperm.slane %v635_v59, 0 }
 0x50f   : > { %v638_v0 = vmul.f32 %v637_v62, %v520_v63 }
 0x511   : > { %v645_v5 = vadd.f32 %v644_v2, %v638_v0 }
 0x512   : > { %v1276_v50 = vpop.eup %1275 }
 0x513   : > { %v1278_v51 = vpop.eup %1277  ;;  %v880_v52 = vmul.f32 %v1276_v50, %v756_v49  ;;  %884 = vperm.xlu1 %1245, %v1276_v50  }
 0x514   : > { %891 = vperm.xlu0 %1244, %v1278_v51  }
 0x515   : > { %v881_v53 = vadd.f32 %v1278_v51, %v880_v52 }
 0x517   : > { %898 = vst.msk [vmem:[#allocation5] sm:$0x1] %vm896_vm3, %v881_v53 }
 0x57d   : > { %v760_v1 = vpop.permute.xlu1 %759 }
 0x57e   : > { %v767_v3 = vpop.permute.xlu0 %766  ;;  %v762_v4 = vperm.slane %v760_v1, 0 }
 0x57f   : > { %v769_v7 = vmul.f32 %v767_v3, %v1947_v21 }
 0x580   : > { %v763_v6 = vmul.f32 %v762_v4, %v645_v5 }
 0x582   : > { %v770_v10 = vadd.f32 %v769_v7, %v763_v6 }
 0x585   : > { %v885_v8 = vpop.permute.xlu1 %884 }
 0x586   : > { %v892_v9 = vpop.permute.xlu0 %891  ;;  %v887_v12 = vperm.slane %v885_v8, 0 }
 0x587   : > { %v894_v14 = vmul.f32 %v892_v9, %v1952_v28 }
 0x588   : > { %v888_v15 = vmul.f32 %v887_v12, %v770_v10  ;;  %903 = sbr.rel (%p1104_p2) target bundleno = 1560 (0x618), region = 60 }
 0x58a   : > { %v895_v13 = vadd.f32 %v894_v14, %v888_v15 }
 0x58c   : > { %899 = vst.msk [vmem:[#allocation6] sm:$0x1] %vm489_vm4, %v895_v13 }
 0x58d   : > { %v905_v22 = vld [vmem:[#allocation5] sm:$0x1]  ;;  %v1573_v16 = vmov 0  }
 0x58e   : > { %1279 = vset.pattern.permute.xlu0 %v1573_v16 }
 0x58f   : > { %908 = vperm.xlu0 %1279, %v905_v22  }
 0x593   : > { %v904_v27 = vld [vmem:[#allocation6] sm:$0x1] }
 0x601   : > { %v909_v17 = vpop.permute.xlu0 %908 }
 0x602   : > { %v911_v18 = vperm.slane %v909_v17, 0 }
 0x604   : > { %1280 = vrcp.f32 %v911_v18  ;;  %v923_v24 = vand.u32 2147483648, %v911_v18  ;;  %v921_v21 = vand.u32 2147483647, %v911_v18  ;;  %vm917_vm7 = vweird.f32 %v911_v18 }
 0x606   : > { %v924_v28 = vor.u32 1.1754944e-38, %v923_v24  ;;  %vm922_vm9 = vcmp.eq.f32.partialorder %v921_v21, 8.507059e+37 }
 0x60a   : > { %v1281_v19 = vpop.eup %1280 }
 0x60b   : > { %v913_v20 = vmul.f32 %v1281_v19, %v911_v18  ;;  %vm918_vm6 = vweird.f32 %v1281_v19 }
 0x60c   : > { %vm919_vm8 = vmor %vm917_vm7, %vm918_vm6 }
 0x60d   : > { %v914_v23 = vsub.f32 1.0, %v913_v20 }
 0x60f   : > { %v915_v25 = vmul.f32 %v1281_v19, %v914_v23 }
 0x611   : > { %v916_v26 = vadd.f32 %v1281_v19, %v915_v25 }
 0x613   : > { %v920_v29 = vsel %vm919_vm8, %v1281_v19, %v916_v26 }
 0x614   : > { %v925_v30 = vsel %vm922_vm9, %v924_v28, %v920_v29 }
 0x615   : > { %v926_v31 = vmul.f32 %v925_v30, %v904_v27 }
 0x617   : > { %927 = vst.msk [vmem:[%s316_s25] sm:$0x1] %vm489_vm4, %v926_v31 }
 0x618 PF: > { %s2080_s9 = sld [smem:[#allocation28_spill]]  ;;  %s939_s15 = sshll.u32 %s316_s25, 4  ;;  %s940_s15 = int_to_ptr.vmem [resolvable:$true] %s939_s15 }
 0x619   : > { %s2081_s6 = sld [smem:[#allocation38_spill]]  ;;  %s929_s18 = scalar_lea.sflag [#allocation12], %s1799_s8 }
 0x61f   : > { %s937_s10 = scalar_lea.hbm %s2081_s6, %s2080_s9  ;;  %s1446_s23 = scalar_lea.hbm %s2081_s6, 2 }
 0x620   : > { %s941_s16 = sshll.u32 %s937_s10, 4  ;;  %s942_s16 = int_to_ptr.hbm [resolvable:$true] %s941_s16 }
 0x621   : > { %s1440_s0 = sshra.s32 %s942_s16, 4  ;;  %s1441_s0 = int_to_ptr.hbm [resolvable:$true] %s1440_s0 }
 0x622   : > { %s1442_s19 = scalar_lea.hbm %s1441_s0, 1  ;;  %p1447_p1 = scmp.lt.s32.totalorder %s1441_s0, %s2081_s6 }
 0x623   : > { %p1443_p0 = scmp.ne.s32.totalorder %s1441_s0, %s1442_s19  ;;  %p1448_p7 = scmp.lt.s32.totalorder %s1446_s23, %s1442_s19 }
 0x625   : > { %p1444_p10 = pnand %p1443_p0, %p1760_p13  ;;  %p1449_p9 = por %p1448_p7, %p1447_p1 }
 0x627   : > { %p1445_p3 = pneg %p1444_p10 }
 0x629   : > { %p1450_p11 = pnand %p1449_p9, %p1445_p3 }
 0x62b   : > { %1453 = shalt.err (!%p1450_p11)
}
 0x62c   : > { %1120 = dma.vmem_to_hbm [thread:$0]  (%p1760_p13), %s940_s15, 16, %s942_s16, %s929_s18  }
 0x62d PF: > { %s2083_s8 = sld [smem:[#allocation26_spill]]  ;;  %p1145_p12 = scmp.ge.s32.totalorder %s1562_s13, 2 }
 0x62f   : > { %p1137_p5 = pnand %p1145_p12, %p1768_p4 }
 0x631   : > { %p1138_p6 = pneg %p1137_p5 }
 0x633   : > { %s953_s20 = sand.u32 1, %s2083_s8  }
 0x634   : > { %s954_s27 = scalar_lea.sflag [#allocation12], %s953_s20 }
 0x635   : > { %1517 = dma.done.wait (%p1138_p6), %s954_s27, 16  }
 0x636   : > { %1519 = vsyncadd (%p1138_p6), %s954_s27, 4294967280  ;;  %s39_s13 = sadd.s32 1, %s1562_s13   ;;  %s2085_s17 = sld [smem:[#allocation25_spill]] }
 0x637   : > { %p36_p8 = scmp.ge.s32.totalorder %s39_s13, 6   ;;  %s2086_s1 = sld [smem:[#allocation32_spill]] }
 0x638   : > { %s2087_s4 = sld [smem:[#allocation27_spill]]  ;;  %s2091_s0 = smov %s1526_s29 }
 0x639   : > { %s2088_s8 = sld [smem:[#allocation31_spill]]  ;;  %s2093_s30 = smov %s1538_s7 }
 0x63a   : > { %s2089_s14 = sld [smem:[#allocation29_spill]]  ;;  %s2095_s9 = smov %s1554_s11 }
 0x63b   : > { %s2090_s21 = sld [smem:[#allocation30_spill]]  ;;  %s2096_s10 = smov %s1558_s12 }
 0x63c   : > { %s2092_s29 = smov %s2085_s17 }
 0x63d   :  { %38 = sbr.rel (!%p36_p8) target bundleno = 22 (0x16), region = 113 }
 0x63e   : > { %s2094_s7 = smov %s2087_s4 }
 0x640   : > { %s2097_s11 = smov %s2089_s14 }
 0x641   : > { %s2098_s12 = smov %s2090_s21 }
 0x642   :  { %959 = vsyncpa [#allocation11], 1 }
 0x643   :  { %961 = vsyncpa [#allocation11 + $0x1], 1 }
 0x644   :  { %962 = vsyncpa [#allocation14], 1 }
 0x645   :  { %964 = vsyncpa [#allocation14 + $0x1], 1 }
 0x646   :  { %965 = vsyncpa [#allocation17], 1 }
 0x647   :  { %966 = vsyncpa [#allocation12], 1 }
 0x648   :  { %968 = vsyncpa [#allocation12 + $0x1], 1 }

</bundles_post_ra>
